<compile_context>
chip_gen: v5e
topology: v5e:2x2
jax: 0.10.0
libtpu: 0.0.40
codegen_flags: <defaults>
</compile_context>

<pallas_src>
from functools import partial

import jax
import jax.numpy as jnp
from jax.experimental import pallas as pl
from jax.experimental.pallas import tpu as pltpu


def _cnn_kernel(xf_ref, sel_ref, slab_ref, out_ref, *, C, K, F, classes, T, n, eps):
    """Fused (pointwise*depthwise) matmul -> ReLU -> BatchNorm(batch stats) -> GAP
    -> Linear(+folded gamma/beta) -> Softmax. Single invocation, everything in VMEM."""
    f32 = jnp.float32
    BLp = xf_ref.shape[1]
    CK = C * K

    # ---- unpack the packed parameter slab (static slices) -------------------
    slab = slab_ref[...]
    w_eff = slab[:F, 0:CK]                          # (F, C*K)   fused conv weight
    b_eff = slab[:F, CK:CK + 1]                     # (F, 1)     fused conv bias
    wfc = slab[:classes, CK + 1:CK + 1 + F]         # (classes, F)  gamma folded in
    bfc = slab[:classes, CK + 1 + F:CK + 2 + F]     # (classes, 1)  beta folded in

    # ---- stacked time-shifted views: row k*C + c holds xf[c, col + k] --------
    xf = xf_ref[...]                                # (C, BLp)
    views = [xf]
    for k in range(1, K):
        views.append(pltpu.roll(xf, shift=BLp - k, axis=1))   # XLU, static shift
    stack = jnp.concatenate(views, axis=0)          # (K*C, BLp), sublane-aligned pieces

    # ---- fused pointwise+depthwise conv: ONE MXU matmul ----------------------
    dw = jnp.dot(w_eff, stack, preferred_element_type=f32) + b_eff   # (F, BLp)
    r = jnp.maximum(dw, 0.0)                                         # ReLU

    # ---- per-batch sums of r and r^2 over valid columns (single matmul) ------
    rq = jnp.concatenate([r, r * r], axis=0)                          # (2F, BLp)
    SQ = jnp.dot(rq, sel_ref[...], preferred_element_type=f32)        # (2F, B)
    S = SQ[:F, :]
    Q = SQ[F:, :]

    # ---- BatchNorm2d(track_running_stats=False): batch stats, biased var -----
    tot = jnp.sum(S, axis=1, keepdims=True)                           # (F, 1)
    sq = jnp.sum(Q, axis=1, keepdims=True)
    mu = tot * (1.0 / n)
    var = jnp.maximum(sq * (1.0 / n) - mu * mu, 0.0)                  # clamp: one-pass var
    invstd = jax.lax.rsqrt(var + eps)

    # GAP(BN(r)) == BN(GAP(r)) since BN is a per-channel affine map; gamma/beta folded
    # into the fc weights at pack time.
    gap = S * (1.0 / T)                                               # (F, B)
    feat = (gap - mu) * invstd                                        # (F, B)

    # ---- fc + softmax over classes -------------------------------------------
    logits = jnp.dot(wfc, feat, preferred_element_type=f32) + bfc     # (classes, B)
    m = jnp.max(logits, axis=0, keepdims=True)
    e = jnp.exp(logits - m)
    out_ref[...] = e / jnp.sum(e, axis=0, keepdims=True)


def pack_interpretable_cnn_mmd(params, *, d, B, L):
    """One-time packing of parameters + validity selector (reuse across calls)."""
    wp = params["pointwise_w"][:, 0, :, 0].astype(jnp.float32)   # (N1, C)
    bp = params["pointwise_b"].astype(jnp.float32)               # (N1,)
    wd = params["depthwise_w"][:, 0, 0, :].astype(jnp.float32)   # (F, K)
    bd = params["depthwise_b"].astype(jnp.float32)               # (F,)
    gamma = params["bn_gamma"].astype(jnp.float32)               # (F,)
    beta = params["bn_beta"].astype(jnp.float32)                 # (F,)
    wfc = params["fc_w"].astype(jnp.float32)                     # (classes, F)
    bfc = params["fc_b"].astype(jnp.float32)                     # (classes,)

    N1, C = wp.shape
    F, K = wd.shape
    classes = wfc.shape[0]
    assert F == d * N1
    T = L - K + 1
    assert T >= 1
    BL = B * L
    BLp = ((BL + 127) // 128) * 128
    # No-wrap guarantee for the rolled views: valid columns are b*L + t with t < T,
    # so the largest shifted index is b*L + (T-1) + (K-1) = b*L + L - 1 < B*L <= BLp.

    grp = jnp.arange(F) // d                                     # PyTorch group of channel o
    wp_g = wp[grp]                                               # (F, C)
    bp_g = bp[grp]                                               # (F,)
    # fused pointwise+depthwise weight; column order matches stack row index k*C + c
    w_eff = (wd[:, :, None] * wp_g[:, None, :]).reshape(F, K * C)
    b_eff = bd + bp_g * jnp.sum(wd, axis=1)
    # fold BN gamma/beta into the fc layer
    wfc_eff = wfc * gamma[None, :]
    bfc_eff = bfc + wfc @ beta

    CK = C * K
    R = max(F, classes)
    slab = jnp.zeros((R, CK + F + 2), jnp.float32)
    slab = slab.at[:F, 0:CK].set(w_eff)
    slab = slab.at[:F, CK].set(b_eff)
    slab = slab.at[:classes, CK + 1:CK + 1 + F].set(wfc_eff)
    slab = slab.at[:classes, CK + 1 + F].set(bfc_eff)

    # per-batch valid-column selector, pre-transposed to (BLp, B) for canonical contraction
    col = jnp.arange(BLp)[:, None]
    b_idx = jnp.arange(B)[None, :]
    sel = ((col >= b_idx * L) & (col < b_idx * L + T)).astype(jnp.float32)

    dims = dict(B=B, C=C, L=L, K=K, F=F, classes=classes, T=T, BLp=BLp)
    return {"slab": slab, "sel": sel, "dims": dims}


@partial(jax.jit, static_argnames=("B", "C", "L", "K", "F", "classes", "T", "BLp"))
def _forward_impl(x, slab, sel, *, B, C, L, K, F, classes, T, BLp):
    BL = B * L
    # signal slab: (C, B*L) zero-padded on lanes to a multiple of 128
    x2 = jnp.transpose(x[:, 0, :, :], (1, 0, 2)).reshape(C, BL).astype(jnp.float32)
    xf = jnp.zeros((C, BLp), jnp.float32).at[:, :BL].set(x2)

    out = pl.pallas_call(
        partial(_cnn_kernel, C=C, K=K, F=F, classes=classes, T=T,
                n=float(B * T), eps=1e-5),
        out_shape=jax.ShapeDtypeStruct((classes, B), jnp.float32),
        in_specs=[pl.BlockSpec(memory_space=pltpu.MemorySpace.VMEM),
                  pl.BlockSpec(memory_space=pltpu.MemorySpace.VMEM),
                  pl.BlockSpec(memory_space=pltpu.MemorySpace.VMEM)],
        out_specs=pl.BlockSpec(memory_space=pltpu.MemorySpace.VMEM),
    )(xf, sel, slab)
    return out.T                                     # (B, classes)


def interpretable_cnn_mmd_forward(x, packed):
    """x: (B, 1, C, L) float32 (PyTorch NCHW). Returns (probs (B, classes), 0, 0)."""
    probs = _forward_impl(x, packed["slab"], packed["sel"], **packed["dims"])
    # eval-mode semantics of the PyTorch module: mmd_loss = 0, outputtarget = 0
    return probs, 0.0, 0.0


def reference_forward(x, params, *, d):
    """Plain-JAX mirror of the PyTorch forward (eval mode) for validation (exact f32)."""
    hp = jax.lax.Precision.HIGHEST
    wp = params["pointwise_w"][:, 0, :, 0]
    bp = params["pointwise_b"]
    wd = params["depthwise_w"][:, 0, 0, :]
    bd = params["depthwise_b"]
    gamma, beta = params["bn_gamma"], params["bn_beta"]
    wfc, bfc = params["fc_w"], params["fc_b"]
    F, K = wd.shape
    B, _, _, L = x.shape
    T = L - K + 1

    pw = jnp.einsum("nc,bcl->bnl", wp, x[:, 0], precision=hp) + bp[None, :, None]
    grp = jnp.arange(F) // d                             # group of torch channel o
    pwg = pw[:, grp, :]                                  # (B, F, L)
    dw = jnp.zeros((B, F, T), jnp.float32)
    for k in range(K):
        dw = dw + wd[None, :, k:k + 1] * pwg[:, :, k:k + T]
    dw = dw + bd[None, :, None]
    r = jnp.maximum(dw, 0.0)
    mu = jnp.mean(r, axis=(0, 2))
    var = jnp.mean((r - mu[None, :, None]) ** 2, axis=(0, 2))
    rn = ((r - mu[None, :, None]) * jax.lax.rsqrt(var + 1e-5)[None, :, None]
          * gamma[None, :, None] + beta[None, :, None])
    gap = jnp.mean(rn, axis=2)                           # (B, F)
    logits = jnp.einsum("bf,cf->bc", gap, wfc, precision=hp) + bfc[None, :]
    return jax.nn.softmax(logits, axis=1)


if __name__ == "__main__":
    # Small shapes consistent with the module (scaled-down defaults).
    B, classes = 2, 2
    C, L = 8, 160            # sampleChannel, sampleLength
    N1, d, K = 8, 2, 33      # kernelLength K -> T = L - K + 1 = 128
    F = d * N1

    key = jax.random.PRNGKey(0)
    ks = jax.random.split(key, 9)
    params = {
        "pointwise_w": 0.3 * jax.random.normal(ks[0], (N1, 1, C, 1), jnp.float32),
        "pointwise_b": 0.1 * jax.random.normal(ks[1], (N1,), jnp.float32),
        "depthwise_w": 0.2 * jax.random.normal(ks[2], (F, 1, 1, K), jnp.float32),
        "depthwise_b": 0.1 * jax.random.normal(ks[3], (F,), jnp.float32),
        "bn_gamma": 1.0 + 0.1 * jax.random.normal(ks[4], (F,), jnp.float32),
        "bn_beta": 0.1 * jax.random.normal(ks[5], (F,), jnp.float32),
        "fc_w": 0.3 * jax.random.normal(ks[6], (classes, F), jnp.float32),
        "fc_b": 0.1 * jax.random.normal(ks[7], (classes,), jnp.float32),
    }
    x = jax.random.normal(ks[8], (B, 1, C, L), jnp.float32)

    packed = pack_interpretable_cnn_mmd(params, d=d, B=B, L=L)   # one-time packing
    probs, mmd_loss, outputtarget = interpretable_cnn_mmd_forward(x, packed)
    probs = jax.block_until_ready(probs)

    ref = reference_forward(x, params, d=d)
    assert probs.shape == (B, classes)
    assert jnp.allclose(jnp.sum(probs, axis=1), 1.0, atol=1e-5)
    # Tolerance covers default (non-HIGHEST) MXU precision vs. the exact-f32 reference.
    assert jnp.allclose(probs, ref, atol=1e-2, rtol=1e-2), (probs, ref)
    print("KERNEL_OK")
</pallas_src>

<mosaic_0001>
module attributes {stable_mosaic.version = 11 : i64} {
  func.func @_cnn_kernel(%arg0: memref<8x384xf32, #tpu.memory_space<vmem>>, %arg1: memref<384x2xf32, #tpu.memory_space<vmem>>, %arg2: memref<16x282xf32, #tpu.memory_space<vmem>>, %arg3: memref<2x2xf32, #tpu.memory_space<vmem>>) attributes {dimension_semantics = [], scalar_prefetch = 0 : i64, scratch_operands = 0 : i64, tpu.core_type = #tpu.core_type<tc>} {
    %c0 = arith.constant 0 : index
    %c0_0 = arith.constant 0 : index
    %0 = vector.load %arg2[%c0, %c0_0] : memref<16x282xf32, #tpu.memory_space<vmem>>, vector<16x282xf32>
    %1 = vector.extract_strided_slice %0 {offsets = [0, 0], sizes = [16, 264], strides = [1, 1]} : vector<16x282xf32> to vector<16x264xf32>
    %2 = vector.extract_strided_slice %0 {offsets = [0, 264], sizes = [16, 1], strides = [1, 1]} : vector<16x282xf32> to vector<16x1xf32>
    %3 = vector.extract_strided_slice %0 {offsets = [0, 265], sizes = [2, 16], strides = [1, 1]} : vector<16x282xf32> to vector<2x16xf32>
    %4 = vector.extract_strided_slice %0 {offsets = [0, 281], sizes = [2, 1], strides = [1, 1]} : vector<16x282xf32> to vector<2x1xf32>
    %c0_1 = arith.constant 0 : index
    %c0_2 = arith.constant 0 : index
    %5 = vector.load %arg0[%c0_1, %c0_2] : memref<8x384xf32, #tpu.memory_space<vmem>>, vector<8x384xf32>
    %c383_i32 = arith.constant 383 : i32
    %6 = tpu.dynamic_rotate %5 by %c383_i32 dim 1 : vector<8x384xf32>, i32 -> vector<8x384xf32>
    %c382_i32 = arith.constant 382 : i32
    %7 = tpu.dynamic_rotate %5 by %c382_i32 dim 1 : vector<8x384xf32>, i32 -> vector<8x384xf32>
    %c381_i32 = arith.constant 381 : i32
    %8 = tpu.dynamic_rotate %5 by %c381_i32 dim 1 : vector<8x384xf32>, i32 -> vector<8x384xf32>
    %c380_i32 = arith.constant 380 : i32
    %9 = tpu.dynamic_rotate %5 by %c380_i32 dim 1 : vector<8x384xf32>, i32 -> vector<8x384xf32>
    %c379_i32 = arith.constant 379 : i32
    %10 = tpu.dynamic_rotate %5 by %c379_i32 dim 1 : vector<8x384xf32>, i32 -> vector<8x384xf32>
    %c378_i32 = arith.constant 378 : i32
    %11 = tpu.dynamic_rotate %5 by %c378_i32 dim 1 : vector<8x384xf32>, i32 -> vector<8x384xf32>
    %c377_i32 = arith.constant 377 : i32
    %12 = tpu.dynamic_rotate %5 by %c377_i32 dim 1 : vector<8x384xf32>, i32 -> vector<8x384xf32>
    %c376_i32 = arith.constant 376 : i32
    %13 = tpu.dynamic_rotate %5 by %c376_i32 dim 1 : vector<8x384xf32>, i32 -> vector<8x384xf32>
    %c375_i32 = arith.constant 375 : i32
    %14 = tpu.dynamic_rotate %5 by %c375_i32 dim 1 : vector<8x384xf32>, i32 -> vector<8x384xf32>
    %c374_i32 = arith.constant 374 : i32
    %15 = tpu.dynamic_rotate %5 by %c374_i32 dim 1 : vector<8x384xf32>, i32 -> vector<8x384xf32>
    %c373_i32 = arith.constant 373 : i32
    %16 = tpu.dynamic_rotate %5 by %c373_i32 dim 1 : vector<8x384xf32>, i32 -> vector<8x384xf32>
    %c372_i32 = arith.constant 372 : i32
    %17 = tpu.dynamic_rotate %5 by %c372_i32 dim 1 : vector<8x384xf32>, i32 -> vector<8x384xf32>
    %c371_i32 = arith.constant 371 : i32
    %18 = tpu.dynamic_rotate %5 by %c371_i32 dim 1 : vector<8x384xf32>, i32 -> vector<8x384xf32>
    %c370_i32 = arith.constant 370 : i32
    %19 = tpu.dynamic_rotate %5 by %c370_i32 dim 1 : vector<8x384xf32>, i32 -> vector<8x384xf32>
    %c369_i32 = arith.constant 369 : i32
    %20 = tpu.dynamic_rotate %5 by %c369_i32 dim 1 : vector<8x384xf32>, i32 -> vector<8x384xf32>
    %c368_i32 = arith.constant 368 : i32
    %21 = tpu.dynamic_rotate %5 by %c368_i32 dim 1 : vector<8x384xf32>, i32 -> vector<8x384xf32>
    %c367_i32 = arith.constant 367 : i32
    %22 = tpu.dynamic_rotate %5 by %c367_i32 dim 1 : vector<8x384xf32>, i32 -> vector<8x384xf32>
    %c366_i32 = arith.constant 366 : i32
    %23 = tpu.dynamic_rotate %5 by %c366_i32 dim 1 : vector<8x384xf32>, i32 -> vector<8x384xf32>
    %c365_i32 = arith.constant 365 : i32
    %24 = tpu.dynamic_rotate %5 by %c365_i32 dim 1 : vector<8x384xf32>, i32 -> vector<8x384xf32>
    %c364_i32 = arith.constant 364 : i32
    %25 = tpu.dynamic_rotate %5 by %c364_i32 dim 1 : vector<8x384xf32>, i32 -> vector<8x384xf32>
    %c363_i32 = arith.constant 363 : i32
    %26 = tpu.dynamic_rotate %5 by %c363_i32 dim 1 : vector<8x384xf32>, i32 -> vector<8x384xf32>
    %c362_i32 = arith.constant 362 : i32
    %27 = tpu.dynamic_rotate %5 by %c362_i32 dim 1 : vector<8x384xf32>, i32 -> vector<8x384xf32>
    %c361_i32 = arith.constant 361 : i32
    %28 = tpu.dynamic_rotate %5 by %c361_i32 dim 1 : vector<8x384xf32>, i32 -> vector<8x384xf32>
    %c360_i32 = arith.constant 360 : i32
    %29 = tpu.dynamic_rotate %5 by %c360_i32 dim 1 : vector<8x384xf32>, i32 -> vector<8x384xf32>
    %c359_i32 = arith.constant 359 : i32
    %30 = tpu.dynamic_rotate %5 by %c359_i32 dim 1 : vector<8x384xf32>, i32 -> vector<8x384xf32>
    %c358_i32 = arith.constant 358 : i32
    %31 = tpu.dynamic_rotate %5 by %c358_i32 dim 1 : vector<8x384xf32>, i32 -> vector<8x384xf32>
    %c357_i32 = arith.constant 357 : i32
    %32 = tpu.dynamic_rotate %5 by %c357_i32 dim 1 : vector<8x384xf32>, i32 -> vector<8x384xf32>
    %c356_i32 = arith.constant 356 : i32
    %33 = tpu.dynamic_rotate %5 by %c356_i32 dim 1 : vector<8x384xf32>, i32 -> vector<8x384xf32>
    %c355_i32 = arith.constant 355 : i32
    %34 = tpu.dynamic_rotate %5 by %c355_i32 dim 1 : vector<8x384xf32>, i32 -> vector<8x384xf32>
    %c354_i32 = arith.constant 354 : i32
    %35 = tpu.dynamic_rotate %5 by %c354_i32 dim 1 : vector<8x384xf32>, i32 -> vector<8x384xf32>
    %c353_i32 = arith.constant 353 : i32
    %36 = tpu.dynamic_rotate %5 by %c353_i32 dim 1 : vector<8x384xf32>, i32 -> vector<8x384xf32>
    %c352_i32 = arith.constant 352 : i32
    %37 = tpu.dynamic_rotate %5 by %c352_i32 dim 1 : vector<8x384xf32>, i32 -> vector<8x384xf32>
    %38 = tpu.concatenate %5, %6, %7, %8, %9, %10, %11, %12, %13, %14, %15, %16, %17, %18, %19, %20 in 0 : vector<8x384xf32>, vector<8x384xf32>, vector<8x384xf32>, vector<8x384xf32>, vector<8x384xf32>, vector<8x384xf32>, vector<8x384xf32>, vector<8x384xf32>, vector<8x384xf32>, vector<8x384xf32>, vector<8x384xf32>, vector<8x384xf32>, vector<8x384xf32>, vector<8x384xf32>, vector<8x384xf32>, vector<8x384xf32> -> vector<128x384xf32>
    %39 = tpu.concatenate %21, %22, %23, %24, %25, %26, %27, %28, %29, %30, %31, %32, %33, %34, %35, %36 in 0 : vector<8x384xf32>, vector<8x384xf32>, vector<8x384xf32>, vector<8x384xf32>, vector<8x384xf32>, vector<8x384xf32>, vector<8x384xf32>, vector<8x384xf32>, vector<8x384xf32>, vector<8x384xf32>, vector<8x384xf32>, vector<8x384xf32>, vector<8x384xf32>, vector<8x384xf32>, vector<8x384xf32>, vector<8x384xf32> -> vector<128x384xf32>
    %40 = tpu.concatenate %38, %39, %37 in 0 : vector<128x384xf32>, vector<128x384xf32>, vector<8x384xf32> -> vector<264x384xf32>
    %cst = arith.constant dense<0.000000e+00> : vector<16x384xf32>
    %41 = tpu.matmul %1, %40, %cst {dimension_numbers = #tpu.dot_dimension_numbers<[1], [0], [0], [1], [0, 0, 1, 1], [], []>} : vector<16x264xf32>, vector<264x384xf32>, vector<16x384xf32> -> vector<16x384xf32>
    %42 = vector.broadcast %2 : vector<16x1xf32> to vector<16x384xf32>
    %43 = arith.addf %41, %42 : vector<16x384xf32>
    %cst_3 = arith.constant 0.000000e+00 : f32
    %44 = vector.broadcast %cst_3 : f32 to vector<16x384xf32>
    %45 = arith.maximumf %43, %44 : vector<16x384xf32>
    %46 = arith.mulf %45, %45 : vector<16x384xf32>
    %47 = tpu.concatenate %45, %46 in 0 : vector<16x384xf32>, vector<16x384xf32> -> vector<32x384xf32>
    %c0_4 = arith.constant 0 : index
    %c0_5 = arith.constant 0 : index
    %48 = vector.load %arg1[%c0_4, %c0_5] : memref<384x2xf32, #tpu.memory_space<vmem>>, vector<384x2xf32>
    %cst_6 = arith.constant dense<0.000000e+00> : vector<32x2xf32>
    %49 = tpu.matmul %47, %48, %cst_6 {dimension_numbers = #tpu.dot_dimension_numbers<[1], [0], [0], [1], [0, 0, 1, 1], [], []>} : vector<32x384xf32>, vector<384x2xf32>, vector<32x2xf32> -> vector<32x2xf32>
    %50 = vector.extract_strided_slice %49 {offsets = [0, 0], sizes = [16, 2], strides = [1, 1]} : vector<32x2xf32> to vector<16x2xf32>
    %51 = vector.extract_strided_slice %49 {offsets = [16, 0], sizes = [16, 2], strides = [1, 1]} : vector<32x2xf32> to vector<16x2xf32>
    %cst_7 = arith.constant dense<0.000000e+00> : vector<16xf32>
    %52 = vector.multi_reduction <add>, %50, %cst_7 [1] : vector<16x2xf32> to vector<16xf32>
    %53 = vector.shape_cast %52 : vector<16xf32> to vector<16x1xf32>
    %cst_8 = arith.constant dense<0.000000e+00> : vector<16xf32>
    %54 = vector.multi_reduction <add>, %51, %cst_8 [1] : vector<16x2xf32> to vector<16xf32>
    %55 = vector.shape_cast %54 : vector<16xf32> to vector<16x1xf32>
    %cst_9 = arith.constant 3.906250e-03 : f32
    %56 = vector.broadcast %cst_9 : f32 to vector<16x1xf32>
    %57 = arith.mulf %53, %56 : vector<16x1xf32>
    %cst_10 = arith.constant 3.906250e-03 : f32
    %58 = vector.broadcast %cst_10 : f32 to vector<16x1xf32>
    %59 = arith.mulf %55, %58 : vector<16x1xf32>
    %60 = arith.mulf %57, %57 : vector<16x1xf32>
    %61 = arith.subf %59, %60 : vector<16x1xf32>
    %cst_11 = arith.constant 0.000000e+00 : f32
    %62 = vector.broadcast %cst_11 : f32 to vector<16x1xf32>
    %63 = arith.maximumf %61, %62 : vector<16x1xf32>
    %cst_12 = arith.constant 9.99999974E-6 : f32
    %64 = vector.broadcast %cst_12 : f32 to vector<16x1xf32>
    %65 = arith.addf %63, %64 : vector<16x1xf32>
    %66 = math.rsqrt %65 : vector<16x1xf32>
    %cst_13 = arith.constant 7.812500e-03 : f32
    %67 = vector.broadcast %cst_13 : f32 to vector<16x2xf32>
    %68 = arith.mulf %50, %67 : vector<16x2xf32>
    %69 = vector.broadcast %57 : vector<16x1xf32> to vector<16x2xf32>
    %70 = arith.subf %68, %69 : vector<16x2xf32>
    %71 = vector.broadcast %66 : vector<16x1xf32> to vector<16x2xf32>
    %72 = arith.mulf %70, %71 : vector<16x2xf32>
    %cst_14 = arith.constant dense<0.000000e+00> : vector<2x2xf32>
    %73 = tpu.matmul %3, %72, %cst_14 {dimension_numbers = #tpu.dot_dimension_numbers<[1], [0], [0], [1], [0, 0, 1, 1], [], []>} : vector<2x16xf32>, vector<16x2xf32>, vector<2x2xf32> -> vector<2x2xf32>
    %74 = vector.broadcast %4 : vector<2x1xf32> to vector<2x2xf32>
    %75 = arith.addf %73, %74 : vector<2x2xf32>
    %cst_15 = arith.constant dense<0xFF800000> : vector<2xf32>
    %76 = vector.multi_reduction <maximumf>, %75, %cst_15 [0] : vector<2x2xf32> to vector<2xf32>
    %77 = vector.shape_cast %76 : vector<2xf32> to vector<1x2xf32>
    %78 = vector.broadcast %77 : vector<1x2xf32> to vector<2x2xf32>
    %79 = arith.subf %75, %78 : vector<2x2xf32>
    %80 = math.exp %79 : vector<2x2xf32>
    %cst_16 = arith.constant dense<0.000000e+00> : vector<2xf32>
    %81 = vector.multi_reduction <add>, %80, %cst_16 [0] : vector<2x2xf32> to vector<2xf32>
    %82 = vector.shape_cast %81 : vector<2xf32> to vector<1x2xf32>
    %83 = vector.broadcast %82 : vector<1x2xf32> to vector<2x2xf32>
    %84 = arith.divf %80, %83 : vector<2x2xf32>
    %c0_17 = arith.constant 0 : index
    %c0_18 = arith.constant 0 : index
    %85 = vector.load %arg3[%c0_17, %c0_18] : memref<2x2xf32, #tpu.memory_space<vmem>>, vector<2x2xf32>
    tpu.vector_store %arg3[%c0_17, %c0_18], %84 {strides = array<i32>} : memref<2x2xf32, #tpu.memory_space<vmem>>, vector<2x2xf32>,
    return
  }
}

</mosaic_0001>

<bundles_post_ra>
// kernel: _forward_impl.1
= control target key start
LH: loop header
LB: loop body
LE: loop exit
PB: predicated region body
PF: predicated region fallthrough
CT: control target
= control target key end

     0   :  { %s1045_s16 = smov 101   ;;  %s1046_s17 = smov 99   ;;  %v29_v6 = vlaneseq  ;;  %s2065_s0 = inlined_call_operand.vmem [shape: f32[8,384], index: 0, kind: input, shape index: {}]   ;;  %s2066_s2 = inlined_call_operand.vmem [shape: f32[16,282], index: 2, kind: input, shape index: {}]   ;;  %s2067_s1 = inlined_call_operand.vmem [shape: f32[384,2], index: 1, kind: input, shape index: {}]   ;;  %s2068_s3 = inlined_call_operand.vmem [shape: f32[2,2], index: 3, kind: output, shape index: {}]  }
   0x1   :  { %v1102_v0 = vld [vmem:[%s2065_s0] sm:$0xff]  ;;  %v1107_v1 = vld [vmem:[%s2065_s0 + $0x8] sm:$0xff]  ;;  %s1047_s18 = smov 97   ;;  %s1048_s19 = smov 102   ;;  %v1131_v3 = vld [vmem:[%s2065_s0 + $0x10] sm:$0xff] }
   0x2   :  { %v1111_v2 = vpack.i.bf16 %v1107_v1, %v1102_v0  ;;  %s1049_s20 = smov 100   ;;  %s1050_s21 = smov 98   ;;  %v1185_v7 = vand.u32 127, %v29_v6 }
   0x3   :  { %s1051_s22 = smov 113   ;;  %s1052_s23 = smov 104  }
   0x4   :  { %894 = vrot.lane.b32.xlu2 %v1111_v2, %s1045_s16  ;;  %884 = vrot.lane.b32.xlu1 %v1111_v2, %s1046_s17  ;;  %s1053_s24 = smov 103   ;;  %s1054_s27 = smov 114   ;;  %vm171_vm0 = vcmp.lt.s32.totalorder %v1185_v7, 113  ;;  %vm161_vm1 = vcmp.lt.s32.totalorder %v1185_v7, 114  ;;  %vm331_vm2 = vcmp.lt.s32.totalorder %v1185_v7, 97  ;;  %vm321_vm3 = vcmp.lt.s32.totalorder %v1185_v7, 98 }
   0x5   :  { %874 = vrot.lane.b32.xlu0 %v1111_v2, %s1047_s18  ;;  %s1055_s28 = smov 105   ;;  %s1056_s29 = smov 106   ;;  %vm311_vm4 = vcmp.lt.s32.totalorder %v1185_v7, 99  ;;  %vm301_vm5 = vcmp.lt.s32.totalorder %v1185_v7, 100  ;;  %vm291_vm6 = vcmp.lt.s32.totalorder %v1185_v7, 101  ;;  %vm281_vm7 = vcmp.lt.s32.totalorder %v1185_v7, 102 }
   0x6   :  { %s1057_s30 = smov 107   ;;  %s1058_s0 = smov 115   ;;  %vm271_vm8 = vcmp.lt.s32.totalorder %v1185_v7, 103  ;;  %vm261_vm9 = vcmp.lt.s32.totalorder %v1185_v7, 104  ;;  %vm251_vm10 = vcmp.lt.s32.totalorder %v1185_v7, 105  ;;  %vm241_vm11 = vcmp.lt.s32.totalorder %v1185_v7, 106 }
   0x7   :  { %s1059_s4 = smov 116   ;;  %s1060_s5 = smov 117   ;;  %vm231_vm12 = vcmp.lt.s32.totalorder %v1185_v7, 107  ;;  %vm151_vm13 = vcmp.lt.s32.totalorder %v1185_v7, 115  ;;  %vm131_vm14 = vcmp.lt.s32.totalorder %v1185_v7, 117  ;;  %vm141_vm15 = vcmp.lt.s32.totalorder %v1185_v7, 116 }
   0x8   :  { %s1061_s6 = smov 108   ;;  %s1062_s7 = smov 109  }
   0x9   :  { %s1063_s8 = smov 110   ;;  %s1064_s9 = smov 118  }
   0xa   :  { %s1065_s10 = smov 119   ;;  %s1066_s11 = smov 120  }
   0xb   :  { %s1067_s12 = smov 111   ;;  %s1068_s13 = smov 112  }
   0xc   :  { %899 = vrot.lane.b32.xlu2 %v1111_v2, %s1048_s19  ;;  %889 = vrot.lane.b32.xlu1 %v1111_v2, %s1049_s20  ;;  %s1069_s14 = smov 121   ;;  %s1070_s15 = smov 122  }
   0xd   :  { %879 = vrot.lane.b32.xlu0 %v1111_v2, %s1050_s21 }
  0x14   :  { %914 = vrot.lane.b32.xlu2 %v1111_v2, %s1051_s22  ;;  %909 = vrot.lane.b32.xlu1 %v1111_v2, %s1052_s23 }
  0x15   :  { %904 = vrot.lane.b32.xlu0 %v1111_v2, %s1053_s24 }
  0x1c   :  { %924 = vrot.lane.b32.xlu2 %v1111_v2, %s1054_s27  ;;  %919 = vrot.lane.b32.xlu1 %v1111_v2, %s1055_s28 }
  0x1d   :  { %169 = vrot.lane.b32.xlu0 %v1131_v3, %s1051_s22 }
  0x24   :  { %329 = vrot.lane.b32.xlu2 %v1131_v3, %s1047_s18  ;;  %929 = vrot.lane.b32.xlu1 %v1111_v2, %s1056_s29  ;;  %s1073_s18 = smov 125  }
  0x25   :  { %159 = vrot.lane.b32.xlu0 %v1131_v3, %s1054_s27 }
  0x2c   :  { %939 = vrot.lane.b32.xlu2 %v1111_v2, %s1057_s30  ;;  %149 = vrot.lane.b32.xlu1 %v1131_v3, %s1058_s0 }
  0x2d   :  { %934 = vrot.lane.b32.xlu0 %v1111_v2, %s1058_s0 }
  0x34   :  { %139 = vrot.lane.b32.xlu2 %v1131_v3, %s1059_s4  ;;  %944 = vrot.lane.b32.xlu1 %v1111_v2, %s1059_s4 }
  0x35   :  { %319 = vrot.lane.b32.xlu0 %v1131_v3, %s1050_s21  ;;  %s1076_s21 = smov 96  }
  0x3c   :  { %954 = vrot.lane.b32.xlu2 %v1111_v2, %s1060_s5  ;;  %309 = vrot.lane.b32.xlu1 %v1131_v3, %s1046_s17  ;;  %s1072_s17 = smov 124  }
  0x3d   :  { %949 = vrot.lane.b32.xlu0 %v1111_v2, %s1061_s6 }
  0x44   :  { %299 = vrot.lane.b32.xlu2 %v1131_v3, %s1049_s20  ;;  %959 = vrot.lane.b32.xlu1 %v1111_v2, %s1062_s7  ;;  %s1075_s20 = smov 127  }
  0x45   :  { %129 = vrot.lane.b32.xlu0 %v1131_v3, %s1060_s5 }
  0x4c   :  { %969 = vrot.lane.b32.xlu2 %v1111_v2, %s1063_s8  ;;  %119 = vrot.lane.b32.xlu1 %v1131_v3, %s1064_s9 }
  0x4d   :  { %964 = vrot.lane.b32.xlu0 %v1111_v2, %s1064_s9 }
  0x54   :  { %109 = vrot.lane.b32.xlu2 %v1131_v3, %s1065_s10  ;;  %974 = vrot.lane.b32.xlu1 %v1111_v2, %s1065_s10 }
  0x55   :  { %289 = vrot.lane.b32.xlu0 %v1131_v3, %s1045_s16  ;;  %s1071_s16 = smov 123  }
  0x5c   :  { %984 = vrot.lane.b32.xlu2 %v1111_v2, %s1066_s11  ;;  %279 = vrot.lane.b32.xlu1 %v1131_v3, %s1048_s19  ;;  %s1074_s19 = smov 126  }
  0x5d   :  { %979 = vrot.lane.b32.xlu0 %v1111_v2, %s1067_s12 }
  0x5e   :  { %v1173_v4 = vpop.permute.xlu2 %894 }
  0x5f   :  { %v897_v33 = vunpack.i.h.bf16 %v1173_v4  ;;  %v2072_v34 = vunpack.i.l.bf16 %v1173_v4 }
  0x61   :  { %v293_v44 = vsel %vm291_vm6, %v2072_v34, %v897_v33 }
  0x64   :  { %269 = vrot.lane.b32.xlu2 %v1131_v3, %s1053_s24  ;;  %989 = vrot.lane.b32.xlu1 %v1111_v2, %s1068_s13 }
  0x65   :  { %99 = vrot.lane.b32.xlu0 %v1131_v3, %s1066_s11 }
  0x66   :  { %v1180_v5 = vpop.permute.xlu2 %899 }
  0x67   :  { %v902_v36 = vunpack.i.h.bf16 %v1180_v5  ;;  %v2071_v37 = vunpack.i.l.bf16 %v1180_v5 }
  0x69   :  { %v283_v47 = vsel %vm281_vm7, %v2071_v37, %v902_v36 }
  0x6c   :  { %259 = vrot.lane.b32.xlu2 %v1131_v3, %s1052_s23  ;;  %89 = vrot.lane.b32.xlu1 %v1131_v3, %s1069_s14 }
  0x6d   :  { %994 = vrot.lane.b32.xlu0 %v1111_v2, %s1069_s14 }
  0x6e   :  { %v1188_v8 = vpop.permute.xlu2 %914 }
  0x6f   :  { %v917_v9 = vunpack.i.h.bf16 %v1188_v8  ;;  %v916_v10 = vunpack.i.l.bf16 %v1188_v8 }
  0x71   :  { %v173_v11 = vsel %vm171_vm0, %v916_v10, %v917_v9 }
  0x72   :  { %360 = vmatpush.msra.mxu0 %v173_v11 }
  0x74   :  { %249 = vrot.lane.b32.xlu2 %v1131_v3, %s1055_s28  ;;  %79 = vrot.lane.b32.xlu1 %v1131_v3, %s1070_s15 }
  0x75   :  { %999 = vrot.lane.b32.xlu0 %v1111_v2, %s1070_s15 }
  0x76   :  { %v1203_v12 = vpop.permute.xlu2 %924  ;;  %v1205_v13 = vpop.permute.xlu1 %884 }
  0x77   :  { %v927_v14 = vunpack.i.h.bf16 %v1203_v12  ;;  %v926_v15 = vunpack.i.l.bf16 %v1203_v12  ;;  %v875_v16 = vpop.permute.xlu0 %874  ;;  %v887_v26 = vunpack.i.h.bf16 %v1205_v13  ;;  %v886_v27 = vunpack.i.l.bf16 %v1205_v13 }
  0x78   :  { %v877_v17 = vunpack.i.h.bf16 %v875_v16  ;;  %v876_v18 = vunpack.i.l.bf16 %v875_v16 }
  0x79   :  { %v163_v19 = vsel %vm161_vm1, %v926_v15, %v927_v14  ;;  %v313_v35 = vsel %vm311_vm4, %v886_v27, %v887_v26 }
  0x7a   :  { %v333_v20 = vsel %vm331_vm2, %v876_v18, %v877_v17  ;;  %361 = vmatpush.msra.mxu0 %v163_v19 }
  0x7b   :  { %383 = vmatpush.msra.mxu3 %v333_v20 }
  0x7c   :  { %239 = vrot.lane.b32.xlu2 %v1131_v3, %s1056_s29  ;;  %69 = vrot.lane.b32.xlu1 %v1131_v3, %s1071_s16 }
  0x7d   :  { %1004 = vrot.lane.b32.xlu0 %v1111_v2, %s1071_s16 }
  0x7e   :  { %v330_v21 = vpop.permute.xlu2 %329  ;;  %v1221_v22 = vpop.permute.xlu1 %889 }
  0x7f   :  { %v1223_v23 = vsel %vm331_vm2, %v330_v21, %v876_v18  ;;  %v1225_v24 = vpop.permute.xlu0 %879  ;;  %v332_v25 = vsel %vm331_vm2, %v877_v17, %v330_v21  ;;  %v892_v30 = vunpack.i.h.bf16 %v1221_v22  ;;  %v891_v31 = vunpack.i.l.bf16 %v1221_v22 }
  0x80   :  { %v882_v28 = vunpack.i.h.bf16 %v1225_v24  ;;  %v881_v29 = vunpack.i.l.bf16 %v1225_v24  ;;  %452 = vmatpush.msra.mxu2 %v332_v25  ;;  %vm201_vm2 = vcmp.lt.s32.totalorder %v1185_v7, 110 }
  0x81   :  { %v303_v40 = vsel %vm301_vm5, %v891_v31, %v892_v30 }
  0x82   :  { %v323_v32 = vsel %vm321_vm3, %v881_v29, %v882_v28 }
  0x83   :  { %384 = vmatpush.msra.mxu3 %v323_v32 }
  0x84   :  { %229 = vrot.lane.b32.xlu2 %v1131_v3, %s1057_s30  ;;  %59 = vrot.lane.b32.xlu1 %v1131_v3, %s1072_s17 }
  0x85   :  { %1009 = vrot.lane.b32.xlu0 %v1111_v2, %s1072_s17  ;;  %385 = vmatpush.msra.mxu3 %v313_v35 }
  0x86   :  { %v1257_v38 = vpop.permute.xlu2 %939  ;;  %v1259_v39 = vpop.permute.xlu1 %909 }
  0x87   :  { %v1267_v41 = vpop.permute.xlu0 %904  ;;  %386 = vmatpush.msra.mxu3 %v303_v40  ;;  %v912_v45 = vunpack.i.h.bf16 %v1259_v39  ;;  %v911_v46 = vunpack.i.l.bf16 %v1259_v39  ;;  %v942_v58 = vunpack.i.h.bf16 %v1257_v38  ;;  %v2070_v59 = vunpack.i.l.bf16 %v1257_v38 }
  0x88   :  { %v907_v42 = vunpack.i.h.bf16 %v1267_v41  ;;  %v906_v43 = vunpack.i.l.bf16 %v1267_v41 }
  0x89   :  { %387 = vmatpush.msra.mxu3 %v293_v44  ;;  %v263_v51 = vsel %vm261_vm9, %v911_v46, %v912_v45  ;;  %v233_v11 = vsel %vm231_vm12, %v2070_v59, %v942_v58 }
  0x8a   :  { %v273_v48 = vsel %vm271_vm8, %v906_v43, %v907_v42 }
  0x8b   :  { %388 = vmatpush.msra.mxu3 %v283_v47 }
  0x8c   :  { %219 = vrot.lane.b32.xlu2 %v1131_v3, %s1061_s6  ;;  %49 = vrot.lane.b32.xlu1 %v1131_v3, %s1073_s18 }
  0x8d   :  { %1014 = vrot.lane.b32.xlu0 %v1111_v2, %s1073_s18  ;;  %389 = vmatpush.msra.mxu3 %v273_v48 }
  0x8e   :  { %v1298_v49 = vpop.permute.xlu2 %139  ;;  %v1300_v50 = vpop.permute.xlu1 %919 }
  0x8f   :  { %v922_v52 = vunpack.i.h.bf16 %v1300_v50  ;;  %v921_v53 = vunpack.i.l.bf16 %v1300_v50  ;;  %v170_v54 = vpop.permute.xlu0 %169  ;;  %390 = vmatpush.msra.mxu3 %v263_v51 }
  0x90   :  { %v1315_v55 = vsel %vm171_vm0, %v917_v9, %v170_v54  ;;  %v1321_v56 = vsel %vm171_vm0, %v170_v54, %v916_v10  ;;  %vm221_vm0 = vcmp.lt.s32.totalorder %v1185_v7, 108 }
  0x91   :  { %v253_v57 = vsel %vm251_vm10, %v921_v53, %v922_v52 }
  0x92   :  { %391 = vmatpush.msra.mxu3 %v253_v57 }
  0x94   :  { %209 = vrot.lane.b32.xlu2 %v1131_v3, %s1062_s7  ;;  %39 = vrot.lane.b32.xlu1 %v1131_v3, %s1074_s19 }
  0x95   :  { %1019 = vrot.lane.b32.xlu0 %v1111_v2, %s1074_s19 }
  0x96   :  { %v1335_v60 = vpop.permute.xlu2 %954  ;;  %v1337_v61 = vpop.permute.xlu1 %929 }
  0x97   :  { %v932_v62 = vunpack.i.h.bf16 %v1337_v61  ;;  %v931_v63 = vunpack.i.l.bf16 %v1337_v61  ;;  %v160_v6 = vpop.permute.xlu0 %159  ;;  %v957_v21 = vunpack.i.h.bf16 %v1335_v60  ;;  %v956_v25 = vunpack.i.l.bf16 %v1335_v60 }
  0x98   :  { %v1347_v8 = vsel %vm161_vm1, %v927_v14, %v160_v6  ;;  %v1353_v9 = vsel %vm161_vm1, %v160_v6, %v926_v15  ;;  %vm211_vm1 = vcmp.lt.s32.totalorder %v1185_v7, 109 }
  0x99   :  { %v243_v10 = vsel %vm241_vm11, %v931_v63, %v932_v62  ;;  %v133_v51 = vsel %vm131_vm14, %v956_v25, %v957_v21 }
  0x9a   :  { %392 = vmatpush.msra.mxu3 %v243_v10 }
  0x9c   :  { %199 = vrot.lane.b32.xlu2 %v1131_v3, %s1063_s8  ;;  %27 = vrot.lane.b32.xlu1 %v1131_v3, %s1075_s20 }
  0x9d   :  { %1024 = vrot.lane.b32.xlu0 %v1111_v2, %s1075_s20  ;;  %393 = vmatpush.msra.mxu3 %v233_v11 }
  0x9e   :  { %v300_v12 = vpop.permute.xlu2 %299  ;;  %v1371_v14 = vpop.permute.xlu1 %149 }
  0x9f   :  { %v1373_v15 = vpop.permute.xlu0 %934  ;;  %v1380_v16 = vsel %vm301_vm5, %v300_v12, %v891_v31 }
  0xa0   :  { %v937_v17 = vunpack.i.h.bf16 %v1373_v15  ;;  %v936_v18 = vunpack.i.l.bf16 %v1373_v15 }
  0xa2   :  { %v153_v19 = vsel %vm151_vm13, %v936_v18, %v937_v17  ;;  %v1391_v20 = vsel %vm151_vm13, %v1371_v14, %v936_v18  ;;  %v302_v18 = vsel %vm301_vm5, %v892_v30, %v300_v12  ;;  %vm101_vm5 = vcmp.lt.s32.totalorder %v1185_v7, 120 }
  0xa3   :  { %362 = vmatpush.msra.mxu0 %v153_v19 }
  0xa4   :  { %1029 = vrot.lane.b32.xlu2 %v1111_v2, %s1076_s21  ;;  %179 = vrot.lane.b32.xlu1 %v1131_v3, %s1068_s13 }
  0xa5   :  { %189 = vrot.lane.b32.xlu0 %v1131_v3, %s1067_s12 }
  0xa6   :  { %v1400_v31 = vpop.permute.xlu2 %969  ;;  %v1402_v32 = vpop.permute.xlu1 %944 }
  0xa7   :  { %v947_v35 = vunpack.i.h.bf16 %v1402_v32  ;;  %v946_v2 = vunpack.i.l.bf16 %v1402_v32  ;;  %v320_v40 = vpop.permute.xlu0 %319 }
  0xa8   :  { %v322_v44 = vsel %vm321_vm3, %v882_v28, %v320_v40  ;;  %v1416_v47 = vsel %vm321_vm3, %v320_v40, %v881_v29  ;;  %vm121_vm3 = vcmp.lt.s32.totalorder %v1185_v7, 118 }
  0xa9   :  { %453 = vmatpush.msra.mxu2 %v322_v44  ;;  %v143_v48 = vsel %vm141_vm15, %v946_v2, %v947_v35  ;;  %v1429_v24 = vsel %vm141_vm15, %v1298_v49, %v946_v2 }
  0xaa   :  { %363 = vmatpush.msra.mxu0 %v143_v48 }
  0xac   :  { %364 = vmatpush.msra.mxu0 %v133_v51 }
  0xad   :  { %339 = vrot.lane.b32.xlu0 %v1131_v3, %s1076_s21 }
  0xae   :  { %v1432_v28 = vpop.permute.xlu2 %109  ;;  %v310_v29 = vpop.permute.xlu1 %309 }
  0xaf   :  { %v1434_v54 = vpop.permute.xlu0 %949  ;;  %v312_v57 = vsel %vm311_vm4, %v887_v26, %v310_v29  ;;  %v1445_v6 = vsel %vm311_vm4, %v310_v29, %v886_v27  ;;  %v2073_v26 = vunpack.i.h.bf16 %v1400_v31  ;;  %v2069_v27 = vunpack.i.l.bf16 %v1400_v31 }
  0xb0   :  { %v952_v10 = vunpack.i.h.bf16 %v1434_v54  ;;  %v951_v11 = vunpack.i.l.bf16 %v1434_v54  ;;  %454 = vmatpush.msra.mxu2 %v312_v57  ;;  %vm111_vm4 = vcmp.lt.s32.totalorder %v1185_v7, 119 }
  0xb1   :  { %v203_v48 = vsel %vm201_vm2, %v2069_v27, %v2073_v26 }
  0xb2   :  { %v223_v13 = vsel %vm221_vm0, %v951_v11, %v952_v10  ;;  %455 = vmatpush.msra.mxu2 %v302_v18 }
  0xb3   :  { %394 = vmatpush.msra.mxu3 %v223_v13 }
  0xb6   :  { %v1461_v19 = vpop.permute.xlu2 %984  ;;  %v1463_v2 = vpop.permute.xlu1 %959 }
  0xb7   :  { %v2075_v22 = vunpack.i.h.bf16 %v1463_v2  ;;  %v2074_v30 = vunpack.i.l.bf16 %v1463_v2  ;;  %v1469_v12 = vpop.permute.xlu0 %129  ;;  %v987_v41 = vunpack.i.h.bf16 %v1461_v19 }
  0xb8   :  { %v1474_v40 = vsel %vm131_vm14, %v1469_v12, %v956_v25 }
  0xb9   :  { %v213_v44 = vsel %vm211_vm1, %v2074_v30, %v2075_v22 }
  0xba   :  { %395 = vmatpush.msra.mxu3 %v213_v44 }
  0xbc   :  { %396 = vmatpush.msra.mxu3 %v203_v48 }
  0xbe   :  { %v270_v51 = vpop.permute.xlu2 %269  ;;  %v1488_v29 = vpop.permute.xlu1 %119 }
  0xbf   :  { %v1490_v25 = vpop.permute.xlu0 %964  ;;  %v272_v57 = vsel %vm271_vm8, %v907_v42, %v270_v51  ;;  %v1501_v18 = vsel %vm271_vm8, %v270_v51, %v906_v43  ;;  %v986_v42 = vunpack.i.l.bf16 %v1461_v19  ;;  %vm191_vm8 = vcmp.lt.s32.totalorder %v1185_v7, 111 }
  0xc0   :  { %v967_v13 = vunpack.i.h.bf16 %v1490_v25  ;;  %v966_v44 = vunpack.i.l.bf16 %v1490_v25 }
  0xc2   :  { %v123_v48 = vsel %vm121_vm3, %v966_v44, %v967_v13  ;;  %v1512_v27 = vsel %vm121_vm3, %v1488_v29, %v966_v44 }
  0xc3   :  { %365 = vmatpush.msra.mxu0 %v123_v48 }
  0xc6   :  { %v260_v43 = vpop.permute.xlu2 %259  ;;  %v1516_v51 = vpop.permute.xlu1 %974 }
  0xc7   :  { %v977_v59 = vunpack.i.h.bf16 %v1516_v51  ;;  %v976_v37 = vunpack.i.l.bf16 %v1516_v51  ;;  %v1522_v34 = vpop.permute.xlu0 %289  ;;  %v262_v44 = vsel %vm261_vm9, %v912_v45, %v260_v43  ;;  %v1532_v48 = vsel %vm261_vm9, %v260_v43, %v911_v46 }
  0xc8   :  { %v292_v26 = vsel %vm291_vm6, %v897_v33, %v1522_v34  ;;  %v103_v45 = vsel %vm101_vm5, %v986_v42, %v987_v41  ;;  %vm181_vm9 = vcmp.lt.s32.totalorder %v1185_v7, 112 }
  0xc9   :  { %456 = vmatpush.msra.mxu2 %v292_v26  ;;  %v113_v51 = vsel %vm111_vm4, %v976_v37, %v977_v59  ;;  %v1548_v39 = vsel %vm111_vm4, %v1432_v28, %v976_v37 }
  0xca   :  { %366 = vmatpush.msra.mxu0 %v113_v51 }
  0xcc   :  { %367 = vmatpush.msra.mxu0 %v103_v45 }
  0xce   :  { %v250_v46 = vpop.permute.xlu2 %249  ;;  %v1550_v43 = vpop.permute.xlu1 %279 }
  0xcf   :  { %v1552_v33 = vpop.permute.xlu0 %979  ;;  %v282_v26 = vsel %vm281_vm7, %v902_v36, %v1550_v43  ;;  %v252_v37 = vsel %vm251_vm10, %v922_v52, %v250_v46  ;;  %v1568_v51 = vsel %vm251_vm10, %v250_v46, %v921_v53  ;;  %vm91_vm10 = vcmp.lt.s32.totalorder %v1185_v7, 121 }
  0xd0   :  { %v982_v45 = vunpack.i.h.bf16 %v1552_v33  ;;  %v981_v30 = vunpack.i.l.bf16 %v1552_v33  ;;  %457 = vmatpush.msra.mxu2 %v282_v26  ;;  %v584_v33 = vld [vmem:[%s2067_s1 + $0x28] sm:$0xff] }
  0xd2   :  { %v193_v36 = vsel %vm191_vm8, %v981_v30, %v982_v45  ;;  %458 = vmatpush.msra.mxu2 %v272_v57 }
  0xd3   :  { %397 = vmatpush.msra.mxu3 %v193_v36  ;;  %v2076_v36 = vunpack.i.h.bf16 %v1463_v2 }
  0xd4   :  { %459 = vmatpush.msra.mxu2 %v262_v44 }
  0xd6   :  { %v240_v50 = vpop.permute.xlu2 %239  ;;  %v1578_v52 = vpop.permute.xlu1 %989  ;;  %460 = vmatpush.msra.mxu2 %v252_v37 }
  0xd7   :  { %v992_v53 = vunpack.i.h.bf16 %v1578_v52  ;;  %v991_v46 = vunpack.i.l.bf16 %v1578_v52  ;;  %v100_v26 = vpop.permute.xlu0 %99  ;;  %v242_v22 = vsel %vm241_vm11, %v932_v62, %v240_v50  ;;  %v1591_v57 = vsel %vm241_vm11, %v240_v50, %v931_v63 }
  0xd8   :  { %461 = vmatpush.msra.mxu2 %v242_v22  ;;  %v1595_v44 = vsel %vm101_vm5, %v100_v26, %v986_v42  ;;  %v152_v63 = vsel %vm151_vm13, %v937_v17, %v1371_v14  ;;  %v142_v14 = vsel %vm141_vm15, %v947_v35, %v1298_v49  ;;  %v122_v49 = vsel %vm121_vm3, %v967_v13, %v1488_v29 }
  0xd9   :  { %v183_v37 = vsel %vm181_vm9, %v991_v46, %v992_v53  ;;  %v112_v35 = vsel %vm111_vm4, %v977_v59, %v1432_v28  ;;  %vm81_vm11 = vcmp.lt.s32.totalorder %v1185_v7, 122  ;;  %v102_v28 = vsel %vm101_vm5, %v987_v41, %v100_v26 }
  0xda   :  { %398 = vmatpush.msra.mxu3 %v183_v37  ;;  %vm71_vm13 = vcmp.lt.s32.totalorder %v1185_v7, 123  ;;  %v2077_v26 = vunpack.i.l.bf16 %v1463_v2  ;;  %v1710_v2 = vld [vmem:[%s2066_s2 + $0x20] sm:$0xff]  ;;  %vm341_vm15 = vcmp.lt.s32.totalorder %v1185_v7, 96  ;;  %vm41_vm3 = vcmp.lt.s32.totalorder %v1185_v7, 126 }
  0xdb   :  { %vm31_vm4 = vcmp.lt.s32.totalorder %v1185_v7, 127 }
  0xdc   :  { %429 = vmatpush.msrb.mxu3 %v1315_v55 }
  0xde   :  { %430 = vmatpush.msrb.mxu3 %v1347_v8  ;;  %v1605_v61 = vpop.permute.xlu2 %229  ;;  %v1607_v62 = vpop.permute.xlu1 %89 }
  0xdf   :  { %v1614_v22 = vpop.permute.xlu0 %994  ;;  %v232_v55 = vsel %vm231_vm12, %v942_v58, %v1605_v61  ;;  %v132_v58 = vsel %vm131_vm14, %v957_v21, %v1469_v12  ;;  %vm61_vm14 = vcmp.lt.s32.totalorder %v1185_v7, 124 }
  0xe0   :  { %431 = vmatpush.msrb.mxu3 %v152_v63  ;;  %v997_v8 = vunpack.i.h.bf16 %v1614_v22  ;;  %v996_v42 = vunpack.i.l.bf16 %v1614_v22  ;;  %462 = vmatpush.msra.mxu2 %v232_v55 }
  0xe2   :  { %432 = vmatpush.msrb.mxu3 %v142_v14  ;;  %v93_v15 = vsel %vm91_vm10, %v996_v42, %v997_v8 }
  0xe3   :  { %368 = vmatpush.msra.mxu0 %v93_v15 }
  0xe4   :  { %433 = vmatpush.msrb.mxu3 %v132_v58 }
  0xe6   :  { %434 = vmatpush.msrb.mxu3 %v122_v49  ;;  %v220_v17 = vpop.permute.xlu2 %219  ;;  %v1643_v32 = vpop.permute.xlu1 %79 }
  0xe7   :  { %v1648_v60 = vpop.permute.xlu0 %999  ;;  %v222_v21 = vsel %vm221_vm0, %v952_v10, %v220_v17  ;;  %v1659_v12 = vsel %vm221_vm0, %v220_v17, %v951_v11  ;;  %v92_v10 = vsel %vm91_vm10, %v997_v8, %v1607_v62  ;;  %v1677_v11 = vld [vmem:[%s2066_s2 + $0x8] sm:$0xff]  ;;  %v2078_v17 = vunpack.i.h.bf16 %v1400_v31 }
  0xe8   :  { %435 = vmatpush.msrb.mxu3 %v112_v35  ;;  %v1002_v29 = vunpack.i.h.bf16 %v1648_v60  ;;  %v1001_v59 = vunpack.i.l.bf16 %v1648_v60  ;;  %463 = vmatpush.msra.mxu2 %v222_v21  ;;  %vm51_vm0 = vcmp.lt.s32.totalorder %v1185_v7, 125  ;;  %v585_v7 = vld [vmem:[%s2067_s1 + $0x30] sm:$0xff] }
  0xe9   :  { %399 = vmatmul.f32.vlgmr.msra.gmra.mxu3 %v1677_v11 }
  0xea   :  { %436 = vmatpush.msrb.mxu3 %v102_v28  ;;  %v83_v54 = vsel %vm81_vm11, %v1001_v59, %v1002_v29  ;;  %v82_v19 = vsel %vm81_vm11, %v1002_v29, %v1643_v32 }
  0xeb   :  { %369 = vmatpush.msra.mxu0 %v83_v54 }
  0xec   :  { %437 = vmatpush.msrb.mxu3 %v92_v10 }
  0xee   :  { %438 = vmatpush.msrb.mxu3 %v82_v19  ;;  %v210_v25 = vpop.permute.xlu2 %209  ;;  %v1683_v13 = vpop.permute.xlu1 %69 }
  0xef   :  { %v1685_v41 = vpop.permute.xlu0 %1004  ;;  %v212_v50 = vsel %vm211_vm1, %v2076_v36, %v210_v25  ;;  %v1696_v37 = vsel %vm211_vm1, %v210_v25, %v2077_v26  ;;  %vm355_vm1 = vcmask 64512  }
  0xf0   :  { %v1007_v63 = vunpack.i.h.bf16 %v1685_v41  ;;  %v1006_v55 = vunpack.i.l.bf16 %v1685_v41  ;;  %464 = vmatpush.msra.mxu2 %v212_v50  ;;  %v608_v41 = vld [vmem:[%s2067_s1 + $0xe8] sm:$0xff] }
  0xf1   :  { %402 = vmatmul.f32.gmra.mxu3 %v1710_v2 }
  0xf2   :  { %v73_v8 = vsel %vm71_vm13, %v1006_v55, %v1007_v63  ;;  %v72_v14 = vsel %vm71_vm13, %v1007_v63, %v1683_v13 }
  0xf3   :  { %370 = vmatpush.msra.mxu0 %v73_v8  ;;  %439 = vmatpush.msrb.mxu3 %v72_v14  ;;  %v1749_v8 = vld [vmem:[%s2066_s2 + $0x10] sm:$0xff]  ;;  %v1077_v14 = vmov 8  }
  0xf4   :  { %1033 = vset.pattern.permute.xlu1 %v1077_v14  ;;  %1034 = vset.pattern.permute.xlu2 %v1077_v14 }
  0xf5   :  { %347 = vperm.xlu1 %1033, %v1749_v8  }
  0xf6   :  { %v1713_v15 = vpop.permute.xlu2 %199  ;;  %v1715_v58 = vpop.permute.xlu1 %59 }
  0xf7   :  { %v1717_v49 = vpop.permute.xlu0 %1009  ;;  %v202_v35 = vsel %vm201_vm2, %v2078_v17, %v1713_v15 }
  0xf8   :  { %v1012_v21 = vunpack.i.h.bf16 %v1717_v49  ;;  %v1011_v29 = vunpack.i.l.bf16 %v1717_v49  ;;  %465 = vmatpush.msra.mxu2 %v202_v35 }
  0xfa   :  { %v63_v28 = vsel %vm61_vm14, %v1011_v29, %v1012_v21  ;;  %v62_v54 = vsel %vm61_vm14, %v1012_v21, %v1715_v58  ;;  %v64_v52 = vsel %vm61_vm14, %v1715_v58, %v1011_v29  ;;  %v582_v29 = vld [vmem:[%s2067_s1 + $0x18] sm:$0xff] }
  0xfb   :  { %371 = vmatpush.msra.mxu0 %v63_v28  ;;  %440 = vmatpush.msrb.mxu3 %v62_v54  ;;  %v1768_v28 = vld [vmem:[%s2066_s2 + $0x28] sm:$0xff] }
  0xfc   :  { %352 = vperm.xlu2 %1034, %v1768_v28  }
  0xfe   :  { %v1734_v10 = vpop.permute.xlu2 %1029  ;;  %v1736_v19 = vpop.permute.xlu1 %49 }
  0xff   :  { %v1032_v25 = vunpack.i.h.bf16 %v1734_v10  ;;  %v1031_v36 = vunpack.i.l.bf16 %v1734_v10  ;;  %v1741_v50 = vpop.permute.xlu0 %1014  ;;  %v604_v10 = vld [vmem:[%s2067_s1 + $0xc8] sm:$0xff] }
 0x100   :  { %v1017_v26 = vunpack.i.h.bf16 %v1741_v50  ;;  %v1016_v63 = vunpack.i.l.bf16 %v1741_v50  ;;  %v602_v50 = vld [vmem:[%s2067_s1 + $0xb8] sm:$0xff] }
 0x101   :  { %v343_v17 = vsel %vm341_vm15, %v1031_v36, %v1032_v25 }
 0x102   :  { %v53_v35 = vsel %vm51_vm0, %v1016_v63, %v1017_v26  ;;  %421 = vmatpush.msra.mxu1 %v343_v17  ;;  %v52_v21 = vsel %vm51_vm0, %v1017_v26, %v1736_v19 }
 0x103   :  { %372 = vmatpush.msra.mxu0 %v53_v35  ;;  %441 = vmatpush.msrb.mxu3 %v52_v21 }
 0x104   :  { %498 = vmatpush.msrb.mxu1 %v1321_v56 }
 0x105   :  { %832 = vmatmul.msk.f32.vlgmr.msra.gmra.mxu1 %vm355_vm1, %v1749_v8 }
 0x106   :  { %499 = vmatpush.msrb.mxu1 %v1353_v9  ;;  %v40_v54 = vpop.permute.xlu1 %39 }
 0x107   :  { %v1020_v14 = vpop.permute.xlu0 %1019 }
 0x108   :  { %v1022_v26 = vunpack.i.h.bf16 %v1020_v14  ;;  %v1021_v17 = vunpack.i.l.bf16 %v1020_v14  ;;  %500 = vmatpush.msrb.mxu1 %v1391_v20 }
 0x10a   :  { %501 = vmatpush.msrb.mxu1 %v1429_v24  ;;  %v43_v56 = vsel %vm41_vm3, %v1021_v17, %v1022_v26  ;;  %v42_v35 = vsel %vm41_vm3, %v1022_v26, %v40_v54  ;;  %v599_v26 = vld [vmem:[%s2067_s1 + $0xa0] sm:$0xff] }
 0x10b   :  { %373 = vmatpush.msra.mxu0 %v43_v56  ;;  %442 = vmatpush.msrb.mxu3 %v42_v35  ;;  %v598_v56 = vld [vmem:[%s2067_s1 + $0x98] sm:$0xff]  ;;  %v625_v35 = vld [vmem:[%s2067_s1 + $0x170] sm:$0xff] }
 0x10c   :  { %502 = vmatpush.msrb.mxu1 %v1474_v40 }
 0x10d   :  { %833 = vmatmul.msk.f32.gmra.mxu1 %vm355_vm1, %v1768_v28 }
 0x10e   :  { %503 = vmatpush.msrb.mxu1 %v1512_v27  ;;  %v28_v9 = vpop.permute.xlu1 %27  ;;  %v94_v27 = vsel %vm91_vm10, %v1607_v62, %v996_v42  ;;  %vm771_vm10 = vcmask 130048  }
 0x10f   :  { %v1025_v21 = vpop.permute.xlu0 %1024 }
 0x110   :  { %v1027_v20 = vunpack.i.h.bf16 %v1025_v21  ;;  %v1026_v24 = vunpack.i.l.bf16 %v1025_v21  ;;  %504 = vmatpush.msrb.mxu1 %v1548_v39  ;;  %v14_v39 = vld [vmem:[%s2066_s2] sm:$0xff]  ;;  %v624_v21 = vld [vmem:[%s2067_s1 + $0x168] sm:$0xff] }
 0x112   :  { %505 = vmatpush.msrb.mxu1 %v1595_v44  ;;  %v33_v14 = vsel %vm31_vm4, %v1026_v24, %v1027_v20  ;;  %v32_v40 = vsel %vm31_vm4, %v1027_v20, %v28_v9  ;;  %v84_v44 = vsel %vm81_vm11, %v1643_v32, %v1001_v59  ;;  %v34_v60 = vsel %vm31_vm4, %v28_v9, %v1026_v24  ;;  %v597_v9 = vld [vmem:[%s2067_s1 + $0x90] sm:$0xff]  ;;  %v596_v20 = vld [vmem:[%s2067_s1 + $0x88] sm:$0xff]  ;;  %v623_v24 = vld [vmem:[%s2067_s1 + $0x160] sm:$0xff] }
 0x113   :  { %374 = vmatpush.msra.mxu0 %v33_v14  ;;  %443 = vmatpush.msrb.mxu3 %v32_v40  ;;  %v2080_v59 = vunpack.i.l.bf16 %v1180_v5  ;;  %v594_v5 = vld [vmem:[%s2067_s1 + $0x78] sm:$0xff]  ;;  %v595_v14 = vld [vmem:[%s2067_s1 + $0x80] sm:$0xff]  ;;  %vm794_vm11 = vcmask 9216  }
 0x114   :  { %506 = vmatpush.msrb.mxu1 %v94_v27  ;;  %v622_v27 = vld [vmem:[%s2067_s1 + $0x158] sm:$0xff] }
 0x115   :  { %375 = vmatpush.msra.mxu0 %v1102_v0  ;;  %444 = vmatpush.msrb.mxu3 %v1107_v1  ;;  %v74_v0 = vsel %vm71_vm13, %v1683_v13, %v1006_v55  ;;  %v593_v13 = vld [vmem:[%s2067_s1 + $0x70] sm:$0xff]  ;;  %v2081_v55 = vunpack.i.l.bf16 %v1257_v38 }
 0x116   :  { %376 = vmatmul.f32.vlgmr.msra.gmra.mxu0 %v14_v39  ;;  %507 = vmatpush.msrb.mxu1 %v84_v44  ;;  %v180_v22 = vpop.permute.xlu1 %179  ;;  %v589_v38 = vld [vmem:[%s2067_s1 + $0x50] sm:$0xff]  ;;  %v620_v44 = vld [vmem:[%s2067_s1 + $0x148] sm:$0xff] }
 0x117   :  { %521 = vmatpush.msra.mxu3 %v1223_v23  ;;  %v1809_v62 = vpop.permute.xlu0 %189  ;;  %v182_v1 = vsel %vm181_vm9, %v992_v53, %v180_v22  ;;  %v1824_v42 = vsel %vm181_vm9, %v180_v22, %v991_v46  ;;  %v44_v53 = vsel %vm41_vm3, %v40_v54, %v1021_v17  ;;  %v234_v58 = vsel %vm231_vm12, %v1605_v61, %v2081_v55  ;;  %v600_v54 = vld [vmem:[%s2067_s1 + $0xa8] sm:$0xff]  ;;  %v626_v17 = vld [vmem:[%s2067_s1 + $0x178] sm:$0xff]  ;;  %v619_v22 = vld [vmem:[%s2067_s1 + $0x140] sm:$0xff] }
 0x118   :  { %508 = vmatpush.msrb.mxu1 %v74_v0  ;;  %v192_v23 = vsel %vm191_vm8, %v982_v45, %v1809_v62  ;;  %445 = vmatmul.f32.vlgmr.msrb.gmra.mxu3 %v14_v39  ;;  %v54_v45 = vsel %vm51_vm0, %v1736_v19, %v1016_v63  ;;  %v194_v49 = vsel %vm191_vm8, %v1809_v62, %v981_v30  ;;  %v607_v30 = vld [vmem:[%s2067_s1 + $0xe0] sm:$0xff]  ;;  %v581_v19 = vld [vmem:[%s2067_s1 + $0x10] sm:$0xff]  ;;  %v618_v62 = vld [vmem:[%s2067_s1 + $0x138] sm:$0xff] }
 0x119   :  { %522 = vmatpush.msra.mxu3 %v1416_v47  ;;  %466 = vmatpush.msra.mxu2 %v192_v23  ;;  %v17_v47 = vld [vmem:[%s2066_s2 + $0x18] sm:$0xff]  ;;  %v579_v63 = vld [vmem:[%s2067_s1] sm:$0xff]  ;;  %v617_v0 = vld [vmem:[%s2067_s1 + $0x130] sm:$0xff] }
 0x11a   :  { %509 = vmatpush.msrb.mxu1 %v64_v52 }
 0x11b   :  { %523 = vmatpush.msra.mxu3 %v1445_v6  ;;  %467 = vmatpush.msra.mxu2 %v182_v1  ;;  %v2079_v6 = vunpack.i.l.bf16 %v1173_v4 }
 0x11c   :  { %510 = vmatpush.msrb.mxu1 %v54_v45  ;;  %468 = vmatmul.f32.vlgmr.msra.gmra.mxu2 %v1677_v11 }
 0x11d   :  { %524 = vmatpush.msra.mxu3 %v1380_v16  ;;  %v294_v46 = vsel %vm291_vm6, %v1522_v34, %v2079_v6  ;;  %v284_v16 = vsel %vm281_vm7, %v1550_v43, %v2080_v59  ;;  %v610_v43 = vld [vmem:[%s2067_s1 + $0xf8] sm:$0xff]  ;;  %vm714_vm6 = vcmask 15360  }
 0x11e   :  { %379 = vmatmul.f32.gmra.mxu0 %v17_v47  ;;  %511 = vmatpush.msrb.mxu1 %v44_v53  ;;  %v615_v53 = vld [vmem:[%s2067_s1 + $0x120] sm:$0xff] }
 0x11f   :  { %525 = vmatpush.msra.mxu3 %v294_v46  ;;  %v340_v32 = vpop.permute.xlu0 %339 }
 0x120   :  { %512 = vmatpush.msrb.mxu1 %v34_v60  ;;  %v342_v4 = vsel %vm341_vm15, %v1032_v25, %v340_v32  ;;  %v344_v34 = vsel %vm341_vm15, %v340_v32, %v1031_v36  ;;  %448 = vmatmul.f32.gmra.mxu3 %v17_v47  ;;  %v603_v25 = vld [vmem:[%s2067_s1 + $0xc0] sm:$0xff]  ;;  %v580_v36 = vld [vmem:[%s2067_s1 + $0x8] sm:$0xff]  ;;  %v614_v32 = vld [vmem:[%s2067_s1 + $0x118] sm:$0xff] }
 0x121   :  { %526 = vmatpush.msra.mxu3 %v284_v16  ;;  %490 = vmatpush.msrb.mxu0 %v342_v4  ;;  %v613_v16 = vld [vmem:[%s2067_s1 + $0x110] sm:$0xff] }
 0x122   :  { %559 = vmatpush.msrb.mxu2 %v344_v34  ;;  %513 = vmatpush.msrb.mxu1 %v1131_v3  ;;  %v609_v3 = vld [vmem:[%s2067_s1 + $0xf0] sm:$0xff] }
 0x123   :  { %527 = vmatpush.msra.mxu3 %v1501_v18  ;;  %514 = vmatmul.f32.vlgmr.msrb.gmra.mxu1 %v14_v39  ;;  %v592_v18 = vld [vmem:[%s2067_s1 + $0x68] sm:$0xff]  ;;  %v621_v39 = vld [vmem:[%s2067_s1 + $0x150] sm:$0xff] }
 0x124   :  { %471 = vmatmul.f32.gmra.mxu2 %v1710_v2  ;;  %627 = vmatpush.msra.mxu0 %v594_v5 }
 0x125   :  { %528 = vmatpush.msra.mxu3 %v1532_v48  ;;  %656 = vmatpush.msra.mxu2 %v610_v43  ;;  %v591_v48 = vld [vmem:[%s2067_s1 + $0x60] sm:$0xff] }
 0x126   :  { %834 = vmatmul.msk.f32.vlgmr.msrb.gmra.mxu0 %vm355_vm1, %v1749_v8  ;;  %685 = vmatpush.msra.mxu1 %v626_v17 }
 0x127   :  { %529 = vmatpush.msra.mxu3 %v1568_v51  ;;  %628 = vmatpush.msra.mxu0 %v593_v13  ;;  %v590_v51 = vld [vmem:[%s2067_s1 + $0x58] sm:$0xff]  ;;  %v612_v13 = vld [vmem:[%s2067_s1 + $0x108] sm:$0xff] }
 0x128   :  { %657 = vmatpush.msra.mxu2 %v609_v3  ;;  %686 = vmatpush.msra.mxu1 %v625_v35 }
 0x129   :  { %530 = vmatpush.msra.mxu3 %v1591_v57  ;;  %629 = vmatpush.msra.mxu0 %v592_v18  ;;  %v2082_v57 = vunpack.i.l.bf16 %v1400_v31  ;;  %v587_v31 = vld [vmem:[%s2067_s1 + $0x40] sm:$0xff] }
 0x12a   :  { %658 = vmatpush.msra.mxu2 %v608_v41  ;;  %687 = vmatpush.msra.mxu1 %v624_v21  ;;  %v611_v41 = vld [vmem:[%s2067_s1 + $0x100] sm:$0xff] }
 0x12b   :  { %531 = vmatpush.msra.mxu3 %v234_v58  ;;  %517 = vmatmul.f32.gmra.mxu1 %v17_v47  ;;  %v204_v61 = vsel %vm201_vm2, %v1713_v15, %v2082_v57  ;;  %v605_v15 = vld [vmem:[%s2067_s1 + $0xd0] sm:$0xff]  ;;  %v616_v47 = vld [vmem:[%s2067_s1 + $0x128] sm:$0xff] }
 0x12c   :  { %836 = vmatmul.msk.f32.vlgmr.msrb.gmra.mxu2 %vm355_vm1, %v1749_v8  ;;  %630 = vmatpush.msra.mxu0 %v591_v48 }
 0x12d   :  { %532 = vmatpush.msra.mxu3 %v1659_v12  ;;  %v588_v12 = vld [vmem:[%s2067_s1 + $0x48] sm:$0xff]  ;;  %659 = vmatpush.msra.mxu2 %v607_v30 }
 0x12e   :  { %835 = vmatmul.msk.f32.gmra.mxu0 %vm355_vm1, %v1768_v28  ;;  %688 = vmatpush.msra.mxu1 %v623_v24 }
 0x12f   :  { %533 = vmatpush.msra.mxu3 %v1696_v37  ;;  %631 = vmatpush.msra.mxu0 %v590_v51  ;;  %v586_v37 = vld [vmem:[%s2067_s1 + $0x38] sm:$0xff] }
 0x130   :  { %689 = vmatpush.msra.mxu1 %v622_v27 }
 0x131   :  { %534 = vmatpush.msra.mxu3 %v204_v61  ;;  %632 = vmatpush.msra.mxu0 %v589_v38 }
 0x132   :  { %690 = vmatpush.msra.mxu1 %v621_v39 }
 0x133   :  { %535 = vmatpush.msra.mxu3 %v194_v49  ;;  %633 = vmatpush.msra.mxu0 %v588_v12 }
 0x134   :  { %837 = vmatmul.msk.f32.gmra.mxu2 %vm355_vm1, %v1768_v28  ;;  %v601_v28 = vld [vmem:[%s2067_s1 + $0xb0] sm:$0xff]  ;;  %691 = vmatpush.msra.mxu1 %v620_v44 }
 0x135   :  { %536 = vmatpush.msra.mxu3 %v1824_v42  ;;  %634 = vmatpush.msra.mxu0 %v587_v31 }
 0x136   :  { %537 = vmatmul.f32.vlgmr.msra.gmra.mxu3 %v1677_v11  ;;  %v606_v11 = vld [vmem:[%s2067_s1 + $0xd8] sm:$0xff]  ;;  %692 = vmatpush.msra.mxu1 %v619_v22 }
 0x137   :  { %635 = vmatpush.msra.mxu0 %v586_v37  ;;  %660 = vmatpush.msra.mxu2 %v606_v11 }
 0x138   :  { %693 = vmatpush.msra.mxu1 %v618_v62 }
 0x139   :  { %636 = vmatpush.msra.mxu0 %v585_v7  ;;  %661 = vmatpush.msra.mxu2 %v605_v15 }
 0x13a   :  { %694 = vmatpush.msra.mxu1 %v617_v0 }
 0x13b   :  { %637 = vmatpush.msra.mxu0 %v584_v33  ;;  %662 = vmatpush.msra.mxu2 %v604_v10 }
 0x13c   :  { %695 = vmatpush.msra.mxu1 %v616_v47 }
 0x13d   :  { %663 = vmatpush.msra.mxu2 %v603_v25 }
 0x13e   :  { %540 = vmatmul.f32.gmra.mxu3 %v1710_v2  ;;  %v583_v2 = vld [vmem:[%s2067_s1 + $0x20] sm:$0xff]  ;;  %696 = vmatpush.msra.mxu1 %v615_v53 }
 0x13f   :  { %638 = vmatpush.msra.mxu0 %v583_v2  ;;  %664 = vmatpush.msra.mxu2 %v602_v50 }
 0x140   :  { %697 = vmatpush.msra.mxu1 %v614_v32 }
 0x141   :  { %639 = vmatpush.msra.mxu0 %v582_v29  ;;  %665 = vmatpush.msra.mxu2 %v601_v28 }
 0x142   :  { %698 = vmatpush.msra.mxu1 %v613_v16 }
 0x143   :  { %640 = vmatpush.msra.mxu0 %v581_v19  ;;  %666 = vmatpush.msra.mxu2 %v600_v54 }
 0x144   :  { %699 = vmatpush.msra.mxu1 %v612_v13 }
 0x145   :  { %641 = vmatpush.msra.mxu0 %v580_v36  ;;  %667 = vmatpush.msra.mxu2 %v599_v26 }
 0x146   :  { %700 = vmatpush.msra.mxu1 %v611_v41 }
 0x147   :  { %642 = vmatpush.msra.mxu0 %v579_v63  ;;  %668 = vmatpush.msra.mxu2 %v598_v56 }
 0x149   :  { %669 = vmatpush.msra.mxu2 %v597_v9 }
 0x14b   :  { %670 = vmatpush.msra.mxu2 %v596_v20 }
 0x14d   :  { %671 = vmatpush.msra.mxu2 %v595_v14 }
 0x156   :  { %v353_v60 = vpop.permute.xlu2 %352 }
 0x167   :  { %v348_v1 = vpop.permute.xlu1 %347 }
 0x16c   :  { %v400_v40 = vpop.f32.mrf.mxu3 }
 0x174   :  { %v403_v42 = vpop.f32.mrf.mxu3 }
 0x182   :  { %v423_v52 = vpop.f32.mrf.mxu1 }
 0x18a   :  { %v426_v3 = vpop.f32.mrf.mxu1 }
 0x193   :  { %v377_v23 = vpop.f32.mrf.mxu0 }
 0x194   :  { %v378_v45 = vadd.f32 %v377_v23, %v348_v1 }
 0x196   :  { %v401_v6 = vadd.f32 %v400_v40, %v378_v45 }
 0x198   :  { %v424_v46 = vadd.f32 %v423_v52, %v401_v6 }
 0x19a   :  { %v567_v59 = vmax.f32 %v424_v46, 0.0 }
 0x19b   :  { %v380_v4 = vpop.f32.mrf.mxu0  ;;  %v446_v34 = vpop.f32.mrf.mxu3 }
 0x19c   :  { %v381_v5 = vadd.f32 %v380_v4, %v353_v60  ;;  %643 = vmatmul.f32.vlgmr.msra.gmra.mxu0 %v567_v59  ;;  %v447_v43 = vadd.f32 %v446_v34, %v348_v1  ;;  %v573_v7 = vmul.f32 %v567_v59, %v567_v59 }
 0x19e   :  { %v404_v18 = vadd.f32 %v403_v42, %v381_v5 }
 0x19f   :  { %v469_v48 = vpop.f32.mrf.mxu2 }
 0x1a0   :  { %v427_v55 = vadd.f32 %v426_v3, %v404_v18  ;;  %v470_v58 = vadd.f32 %v469_v48, %v447_v43  ;;  %v515_v15 = vpop.f32.mrf.mxu1 }
 0x1a1   :  { %v516_v19 = vadd.f32 %v515_v15, %v348_v1 }
 0x1a2   :  { %v570_v51 = vmax.f32 %v427_v55, 0.0 }
 0x1a3   :  { %v492_v38 = vpop.f32.mrf.mxu0  ;;  %v449_v57 = vpop.f32.mrf.mxu3 }
 0x1a4   :  { %v493_v61 = vadd.f32 %v492_v38, %v470_v58  ;;  %646 = vmatmul.f32.gmra.mxu0 %v570_v51  ;;  %v450_v12 = vadd.f32 %v449_v57, %v353_v60  ;;  %v576_v2 = vmul.f32 %v570_v51, %v570_v51  ;;  %v1078_v57 = vmov 25  }
 0x1a5   :  { %1035 = vset.pattern.permute.xlu1 %v1078_v57  ;;  %1036 = vset.pattern.permute.xlu0 %v1078_v57 }
 0x1a6   :  { %v568_v49 = vmax.f32 %v493_v61, 0.0 }
 0x1a7   :  { %v472_v31 = vpop.f32.mrf.mxu2 }
 0x1a8   :  { %672 = vmatmul.f32.vlgmr.msra.gmra.mxu2 %v568_v49  ;;  %v473_v37 = vadd.f32 %v472_v31, %v450_v12  ;;  %v574_v29 = vmul.f32 %v568_v49, %v568_v49  ;;  %v518_v63 = vpop.f32.mrf.mxu1 }
 0x1a9   :  { %v519_v26 = vadd.f32 %v518_v63, %v353_v60 }
 0x1ab   :  { %v495_v30 = vpop.f32.mrf.mxu0 }
 0x1ac   :  { %v496_v33 = vadd.f32 %v495_v30, %v473_v37  ;;  %649 = vmatmul.f32.gmra.mxu0 %v573_v7 }
 0x1ae   :  { %v571_v11 = vmax.f32 %v496_v33, 0.0 }
 0x1af   :  { %v561_v10 = vpop.f32.mrf.mxu2 }
 0x1b0   :  { %675 = vmatmul.f32.gmra.mxu2 %v571_v11  ;;  %v577_v54 = vmul.f32 %v571_v11, %v571_v11 }
 0x1b4   :  { %652 = vmatmul.f32.gmra.mxu0 %v576_v2 }
 0x1b7   :  { %v564_v56 = vpop.f32.mrf.mxu2 }
 0x1b8   :  { %678 = vmatmul.f32.gmra.mxu2 %v574_v29 }
 0x1b9   :  { %v538_v25 = vpop.f32.mrf.mxu3 }
 0x1ba   :  { %v539_v36 = vadd.f32 %v538_v25, %v516_v19 }
 0x1bc   :  { %v562_v50 = vadd.f32 %v561_v10, %v539_v36 }
 0x1be   :  { %v569_v28 = vmax.f32 %v562_v50, 0.0 }
 0x1c0   :  { %701 = vmatmul.f32.vlgmr.msra.gmra.mxu1 %v569_v28  ;;  %681 = vmatmul.f32.gmra.mxu2 %v577_v54  ;;  %v575_v20 = vmul.f32 %v569_v28, %v569_v28 }
 0x1c1   :  { %v541_v17 = vpop.f32.mrf.mxu3 }
 0x1c2   :  { %v542_v35 = vadd.f32 %v541_v17, %v519_v26 }
 0x1c4   :  { %v565_v9 = vadd.f32 %v564_v56, %v542_v35 }
 0x1c6   :  { %v572_v21 = vmax.f32 %v565_v9, 0.0 }
 0x1c8   :  { %704 = vmatmul.f32.gmra.mxu1 %v572_v21  ;;  %v578_v24 = vmul.f32 %v572_v21, %v572_v21 }
 0x1d0   :  { %707 = vmatmul.f32.gmra.mxu1 %v575_v20 }
 0x1d8   :  { %710 = vmatmul.f32.gmra.mxu1 %v578_v24 }
 0x219   :  { %v644_v40 = vpop.f32.mrf.mxu0 }
 0x221   :  { %v647_v62 = vpop.f32.mrf.mxu0 }
 0x229   :  { %v650_v47 = vpop.f32.mrf.mxu0 }
 0x22b   :  { %v673_v14 = vpop.f32.mrf.mxu2 }
 0x22c   :  { %v674_v27 = vadd.f32 %v673_v14, %v644_v40 }
 0x231   :  { %v653_v46 = vpop.f32.mrf.mxu0 }
 0x233   :  { %v676_v39 = vpop.f32.mrf.mxu2 }
 0x234   :  { %v677_v1 = vadd.f32 %v676_v39, %v647_v62 }
 0x23b   :  { %v679_v52 = vpop.f32.mrf.mxu2 }
 0x23c   :  { %v680_v4 = vadd.f32 %v679_v52, %v650_v47 }
 0x23d   :  { %v702_v44 = vpop.f32.mrf.mxu1 }
 0x23e   :  { %v2048_v22 = vadd.f32 %v702_v44, %v674_v27 }
 0x240   :  { %v715_v0 = vsel %vm714_vm6, %v2048_v22, 0.0  ;;  %v759_v26 = vmul.f32 0.0078125, %v2048_v22 }
 0x241   :  { %716 = vadd.xlane.f32.xlu1 %v715_v0 }
 0x243   :  { %v682_v6 = vpop.f32.mrf.mxu2 }
 0x244   :  { %v683_v32 = vadd.f32 %v682_v6, %v653_v46 }
 0x245   :  { %v705_v42 = vpop.f32.mrf.mxu1 }
 0x246   :  { %v706_v23 = vadd.f32 %v705_v42, %v677_v1 }
 0x248   :  { %v718_v45 = vsel %vm714_vm6, %v706_v23, 0.0  ;;  %v760_v10 = vmul.f32 0.0078125, %v706_v23 }
 0x249   :  { %719 = vadd.xlane.f32.xlu0 %v718_v45 }
 0x24d   :  { %v708_v53 = vpop.f32.mrf.mxu1 }
 0x24e   :  { %v709_v34 = vadd.f32 %v708_v53, %v680_v4 }
 0x250   :  { %v721_v5 = vsel %vm714_vm6, %v709_v34, 0.0 }
 0x255   :  { %v711_v60 = vpop.f32.mrf.mxu1 }
 0x256   :  { %v712_v59 = vadd.f32 %v711_v60, %v683_v32 }
 0x258   :  { %v724_v16 = vsel %vm714_vm6, %v712_v59, 0.0 }
 0x259   :  { %725 = vadd.xlane.f32.xlu2 %v724_v16 }
 0x25a   :  { %766 = vperm.xlu1 %1035, %v1749_v8  }
 0x25d   :  { %769 = vrot.lane.b32.xlu0 %v1749_v8, %s1065_s10 }
 0x261   :  { %722 = vadd.xlane.f32.xlu2 %v721_v5 }
 0x2b4   :  { %v717_v48 = vpop.xlane.xlu1 %716 }
 0x2b5   :  { %v727_v58 = vmul.f32 0.00390625, %v717_v48 }
 0x2b7   :  { %v731_v12 = vmul.f32 %v727_v58, %v727_v58  ;;  %v761_v56 = vsub.f32 %v759_v26, %v727_v58 }
 0x2bc   :  { %v720_v43 = vpop.xlane.xlu0 %719 }
 0x2bd   :  { %v728_v13 = vmul.f32 0.00390625, %v720_v43 }
 0x2bf   :  { %v732_v18 = vmul.f32 %v728_v13, %v728_v13  ;;  %v762_v36 = vsub.f32 %v760_v10, %v728_v13 }
 0x2cc   :  { %v726_v3 = vpop.xlane.xlu2 %725  ;;  %v767_v20 = vpop.permute.xlu1 %766 }
 0x2cd   :  { %v730_v41 = vmul.f32 0.00390625, %v726_v3 }
 0x2cf   :  { %v734_v55 = vsub.f32 %v730_v41, %v732_v18  ;;  %v770_v9 = vpop.permute.xlu0 %769 }
 0x2d1   :  { %v736_v51 = vmax.f32 %v734_v55, 0.0 }
 0x2d3   :  { %v738_v38 = vadd.f32 1e-05, %v736_v51 }
 0x2d4   :  { %v723_v61 = vpop.xlane.xlu2 %722 }
 0x2d5   :  { %1037 = vrsqrt.f32 %v738_v38  ;;  %v729_v49 = vmul.f32 0.00390625, %v723_v61  ;;  %vm755_vm12 = vweird.f32 %v738_v38 }
 0x2d7   :  { %v733_v31 = vsub.f32 %v729_v49, %v731_v12 }
 0x2d9   :  { %v735_v37 = vmax.f32 %v733_v31, 0.0 }
 0x2db   :  { %v1038_v7 = vpop.eup %1037  ;;  %v737_v30 = vadd.f32 1e-05, %v735_v37 }
 0x2dc   :  { %v750_v33 = vmul.f32 %v1038_v7, %v738_v38  ;;  %vm756_vm7 = vweird.f32 %v1038_v7 }
 0x2dd   :  { %1039 = vrsqrt.f32 %v737_v30  ;;  %vm757_vm2 = vmor %vm755_vm12, %vm756_vm7  ;;  %vm745_vm8 = vweird.f32 %v737_v30 }
 0x2de   :  { %v751_v11 = vmul.f32 %v1038_v7, %v750_v33 }
 0x2e0   :  { %v752_v2 = vmul.f32 0.5, %v751_v11 }
 0x2e2   :  { %v753_v15 = vsub.f32 1.5, %v752_v2 }
 0x2e3   :  { %v1040_v29 = vpop.eup %1039 }
 0x2e4   :  { %v740_v19 = vmul.f32 %v1040_v29, %v737_v30  ;;  %v754_v25 = vmul.f32 %v1038_v7, %v753_v15  ;;  %vm746_vm5 = vweird.f32 %v1040_v29 }
 0x2e5   :  { %vm747_vm9 = vmor %vm745_vm8, %vm746_vm5 }
 0x2e6   :  { %v741_v8 = vmul.f32 %v1040_v29, %v740_v19  ;;  %v758_v50 = vsel %vm757_vm2, %v1038_v7, %v754_v25 }
 0x2e7   :  { %v764_v63 = vmul.f32 %v762_v36, %v758_v50 }
 0x2e8   :  { %v742_v28 = vmul.f32 0.5, %v741_v8 }
 0x2e9   :  { %788 = vmatpush.msrb.mxu1 %v764_v63 }
 0x2ea   :  { %v743_v54 = vsub.f32 1.5, %v742_v28 }
 0x2ec   :  { %v744_v17 = vmul.f32 %v1040_v29, %v743_v54 }
 0x2ee   :  { %v748_v35 = vsel %vm747_vm9, %v1040_v29, %v744_v17 }
 0x2ef   :  { %v763_v21 = vmul.f32 %v761_v56, %v748_v35 }
 0x2f1   :  { %789 = vmatpush.msrb.mxu1 %v763_v21 }
 0x2f2   :  { %838 = vmatmul.msk.f32.vlgmr.msrb.gmra.mxu1 %vm771_vm10, %v770_v9 }
 0x36f   :  { %v791_v24 = vpop.f32.mrf.mxu1 }
 0x370   :  { %v792_v14 = vadd.f32 %v791_v24, %v767_v20 }
 0x372   :  { %v795_v40 = vsel %vm794_vm11, %v792_v14, -inf }
 0x373   :  { %v796_v27 = vrot.slane %v795_v40, 4 }
 0x375   :  { %v797_v39 = vmax.f32 %v795_v40, %v796_v27 }
 0x377   :  { %v798_v44 = vrot.slane %v797_v39, 2 }
 0x379   :  { %v799_v22 = vmax.f32 %v797_v39, %v798_v44 }
 0x37b   :  { %v800_v62 = vrot.slane %v799_v22, 1 }
 0x37d   :  { %v801_v0 = vmax.f32 %v799_v22, %v800_v62 }
 0x37f   :  { %v802_v1 = vsub.f32 %v792_v14, %v801_v0 }
 0x381   :  { %v803_v42 = vmul.f32 1.442695, %v802_v1 }
 0x383   :  { %1041 = vpow2.f32 %v803_v42 }
 0x389   :  { %v1042_v23 = vpop.eup %1041 }
 0x38a   :  { %v805_v52 = vsel %vm794_vm11, %v1042_v23, 0.0 }
 0x38b   :  { %v806_v45 = vrot.slane %v805_v52, 4 }
 0x38d   :  { %v807_v47 = vadd.f32 %v806_v45, %v805_v52 }
 0x38f   :  { %v808_v53 = vrot.slane %v807_v47, 2 }
 0x391   :  { %v809_v6 = vadd.f32 %v808_v53, %v807_v47 }
 0x393   :  { %v810_v46 = vrot.slane %v809_v6, 1 }
 0x395   :  { %v811_v32 = vadd.f32 %v810_v46, %v809_v6 }
 0x397   :  { %1043 = vrcp.f32 %v811_v32  ;;  %v823_v4 = vand.u32 2147483648, %v811_v32  ;;  %v821_v5 = vand.u32 2147483647, %v811_v32  ;;  %vm817_vm14 = vweird.f32 %v811_v32 }
 0x399   :  { %v824_v13 = vor.u32 1.1754944e-38, %v823_v4  ;;  %vm822_vm0 = vcmp.eq.f32.partialorder %v821_v5, 8.507059e+37 }
 0x39d   :  { %v1044_v60 = vpop.eup %1043 }
 0x39e   :  { %v813_v59 = vmul.f32 %v1044_v60, %v811_v32  ;;  %vm818_vm13 = vweird.f32 %v1044_v60 }
 0x39f   :  { %vm819_vm15 = vmor %vm817_vm14, %vm818_vm13 }
 0x3a0   :  { %v814_v16 = vsub.f32 1.0, %v813_v59 }
 0x3a2   :  { %v815_v34 = vmul.f32 %v1044_v60, %v814_v16 }
 0x3a4   :  { %v816_v43 = vadd.f32 %v1044_v60, %v815_v34 }
 0x3a6   :  { %v820_v3 = vsel %vm819_vm15, %v1044_v60, %v816_v43 }
 0x3a7   :  { %v825_v18 = vsel %vm822_vm0, %v824_v13, %v820_v3 }
 0x3a8   :  { %v826_v41 = vmul.f32 %v1042_v23, %v825_v18 }
 0x3aa   :  { %827 = vst.msk [vmem:[%s2068_s3] sm:$0x3] %vm794_vm11, %v826_v41 }

</bundles_post_ra>
